<compile_context>
chip_gen: v7x
topology: tpu7x:2x2x1
jax: 0.10.0
libtpu: 0.0.40
codegen_flags: <defaults>
</compile_context>

<pallas_src>
from functools import partial

import jax
import jax.numpy as jnp
from jax.experimental import pallas as pl
from jax.experimental.pallas import tpu as pltpu


TILE_M = 256                     # M-tile rows for the fused matmul grid.
_VMEM_LIMIT = 32 * 1024 * 1024   # safe on v5e/v6e/v7x; worst-case tile set ~15 MB.


def _round_up(a, b):
    return (a + b - 1) // b * b


# ---------------------------------------------------------------------------
# Pallas kernels
# ---------------------------------------------------------------------------
def _matmul_bn_kernel(x_ref, w_ref, s_ref, b_ref, o_ref, *, relu):
    # bf16 (tm,K) @ (K,N) on the MXU, f32 accumulation, then per-channel
    # scale/bias (folded conv-bias + BatchNorm) and optional ReLU in f32.
    acc = jnp.dot(x_ref[...], w_ref[...], preferred_element_type=jnp.float32)
    y = acc * s_ref[...] + b_ref[...]
    if relu:
        y = jnp.maximum(y, 0.0)
    o_ref[...] = y.astype(o_ref.dtype)


def _matmul_bn_res_kernel(x_ref, w_ref, s_ref, b_ref, r_ref, o_ref, *, relu):
    # Same as above + residual add (in f32) before the ReLU (BasicBlock tail).
    acc = jnp.dot(x_ref[...], w_ref[...], preferred_element_type=jnp.float32)
    y = acc * s_ref[...] + b_ref[...] + r_ref[...].astype(jnp.float32)
    if relu:
        y = jnp.maximum(y, 0.0)
    o_ref[...] = y.astype(o_ref.dtype)


def _maxpool_kernel(p_ref, o_ref):
    # p_ref: (k*k, M, C) shifted windows -> max over the window axis.
    o_ref[...] = jnp.max(p_ref[...], axis=0)


def _avgpool_kernel(x_ref, o_ref):
    # x_ref: (N, H*W, C) -> global average pool over spatial axis (f32 accum).
    o_ref[...] = jnp.mean(x_ref[...].astype(jnp.float32), axis=1)


# ---------------------------------------------------------------------------
# Fused matmul wrapper: M-tiled grid, bf16 operands, f32 epilogue.
# ---------------------------------------------------------------------------
def fused_matmul(x, w, scale, bias, residual=None, relu=True,
                 out_dtype=jnp.bfloat16):
    M, K = x.shape
    _, N = w.shape
    x = x.astype(jnp.bfloat16)
    w = w.astype(jnp.bfloat16)
    scale2 = scale.reshape(1, N).astype(jnp.float32)
    bias2 = bias.reshape(1, N).astype(jnp.float32)

    # Lane-align ragged contraction dims (stem conv: K = 7*7*3 = 147 -> 256).
    if K % 8 != 0:
        k_pad = _round_up(K, 128)
        x = jnp.pad(x, ((0, 0), (0, k_pad - K)))
        w = jnp.pad(w, ((0, k_pad - K), (0, 0)))
        K = k_pad

    # Pick an M tile and zero-pad M so the grid divides evenly.
    tile_m = TILE_M if M >= TILE_M else _round_up(M, 8)
    m_pad = _round_up(M, tile_m)
    if m_pad != M:
        x = jnp.pad(x, ((0, m_pad - M), (0, 0)))
        if residual is not None:
            residual = jnp.pad(residual, ((0, m_pad - M), (0, 0)))
    num_m = m_pad // tile_m

    inputs = [x, w, scale2, bias2]
    in_specs = [
        pl.BlockSpec((tile_m, K), lambda i: (i, 0)),
        # Weight / scale / bias index_maps ignore the M axis -> these blocks
        # stay resident in VMEM across M steps (no re-DMA per tile).
        pl.BlockSpec((K, N), lambda i: (0, 0)),
        pl.BlockSpec((1, N), lambda i: (0, 0)),
        pl.BlockSpec((1, N), lambda i: (0, 0)),
    ]
    if residual is not None:
        inputs.append(residual.astype(jnp.bfloat16))
        in_specs.append(pl.BlockSpec((tile_m, N), lambda i: (i, 0)))
        kernel = partial(_matmul_bn_res_kernel, relu=relu)
    else:
        kernel = partial(_matmul_bn_kernel, relu=relu)

    out = pl.pallas_call(
        kernel,
        out_shape=jax.ShapeDtypeStruct((m_pad, N), out_dtype),
        grid=(num_m,),
        in_specs=in_specs,
        out_specs=pl.BlockSpec((tile_m, N), lambda i: (i, 0)),
        compiler_params=pltpu.CompilerParams(
            dimension_semantics=("parallel",),
            vmem_limit_bytes=_VMEM_LIMIT,
        ),
    )(*inputs)
    return out[:M] if m_pad != M else out


# ---------------------------------------------------------------------------
# Pooling kernels (stem maxpool runs once, global avgpool is tiny; single-block
# calls are sufficient — last-two block dims equal the full array dims).
# ---------------------------------------------------------------------------
def maxpool2d(x, k=3, stride=2, pad=1):
    # TODO(synk): the k*k shifted windows are still stacked JAX-side (bf16);
    # an in-kernel strided-window max would cut this one-off stem traffic ~9x.
    N, H, W, C = x.shape
    Ho = (H + 2 * pad - k) // stride + 1
    Wo = (W + 2 * pad - k) // stride + 1
    xp = jnp.pad(x.astype(jnp.bfloat16),
                 ((0, 0), (pad, pad), (pad, pad), (0, 0)),
                 constant_values=-jnp.inf)
    wins = []
    for i in range(k):
        for j in range(k):
            wins.append(xp[:, i:i + stride * Ho:stride, j:j + stride * Wo:stride, :])
    p = jnp.stack(wins, axis=0).reshape(k * k, N * Ho * Wo, C)

    out = pl.pallas_call(
        _maxpool_kernel,
        out_shape=jax.ShapeDtypeStruct((N * Ho * Wo, C), jnp.bfloat16),
        grid=(1,),
        in_specs=[pl.BlockSpec((k * k, N * Ho * Wo, C), lambda i: (0, 0, 0))],
        out_specs=pl.BlockSpec((N * Ho * Wo, C), lambda i: (0, 0)),
        compiler_params=pltpu.CompilerParams(vmem_limit_bytes=_VMEM_LIMIT),
    )(p)
    return out.reshape(N, Ho, Wo, C)


def global_avgpool(x):
    N, H, W, C = x.shape
    x2 = x.astype(jnp.bfloat16).reshape(N, H * W, C)
    return pl.pallas_call(
        _avgpool_kernel,
        out_shape=jax.ShapeDtypeStruct((N, C), jnp.float32),
        grid=(1,),
        in_specs=[pl.BlockSpec((N, H * W, C), lambda i: (0, 0, 0))],
        out_specs=pl.BlockSpec((N, C), lambda i: (0, 0)),
    )(x2)


# ---------------------------------------------------------------------------
# Conv (im2col glue, bf16) + fused BN/ReLU/residual in the Pallas matmul kernel
# ---------------------------------------------------------------------------
def _im2col(x, kh, kw, stride, pad):
    N, H, W, C = x.shape
    Ho = (H + 2 * pad - kh) // stride + 1
    Wo = (W + 2 * pad - kw) // stride + 1
    xp = jnp.pad(x, ((0, 0), (pad, pad), (pad, pad), (0, 0)))
    cols = []
    for i in range(kh):
        for j in range(kw):
            cols.append(xp[:, i:i + stride * Ho:stride, j:j + stride * Wo:stride, :])
    patches = jnp.stack(cols, axis=3)              # (N, Ho, Wo, kh*kw, C) bf16
    return patches.reshape(N * Ho * Wo, kh * kw * C), Ho, Wo


def conv_bn(x, w, conv_b, bn, stride, pad, relu=True, residual=None):
    kh, kw, cin, cout = w.shape
    N = x.shape[0]
    cols, Ho, Wo = _im2col(x.astype(jnp.bfloat16), kh, kw, stride, pad)
    w2 = w.reshape(kh * kw * cin, cout)

    gamma, beta, mean, var = bn
    scale = gamma / jnp.sqrt(var + 1e-5)
    shift = beta - mean * scale
    bias = shift if conv_b is None else scale * conv_b + shift

    res2 = None if residual is None else residual.reshape(N * Ho * Wo, cout)
    y = fused_matmul(cols, w2, scale, bias, residual=res2, relu=relu,
                     out_dtype=jnp.bfloat16)
    return y.reshape(N, Ho, Wo, cout)


# ---------------------------------------------------------------------------
# Parameters (deterministic synthetic init)
# ---------------------------------------------------------------------------
class ParamGen:
    def __init__(self, key):
        self.key = key
        self.count = 0

    def _next(self):
        self.count += 1
        return jax.random.fold_in(self.key, self.count)

    def conv(self, kh, kw, cin, cout, bias=True):
        fan_in = kh * kw * cin
        w = jax.random.normal(self._next(), (kh, kw, cin, cout), jnp.float32)
        w = w * (1.0 / jnp.sqrt(fan_in))
        b = (0.01 * jax.random.normal(self._next(), (cout,), jnp.float32)
             if bias else None)
        return w, b

    def bn(self, c):
        gamma = 1.0 + 0.1 * jax.random.normal(self._next(), (c,), jnp.float32)
        beta = 0.1 * jax.random.normal(self._next(), (c,), jnp.float32)
        mean = 0.1 * jax.random.normal(self._next(), (c,), jnp.float32)
        var = 0.5 + jax.random.uniform(self._next(), (c,), jnp.float32)
        return (gamma, beta, mean, var)

    def linear(self, cin, cout):
        w = jax.random.normal(self._next(), (cin, cout), jnp.float32)
        w = w * (1.0 / jnp.sqrt(cin))
        b = 0.01 * jax.random.normal(self._next(), (cout,), jnp.float32)
        return w, b


def basic_block_params(pg, cin, cout, downsample):
    p = {
        "conv1": pg.conv(3, 3, cin, cout, bias=True),
        "bn1": pg.bn(cout),
        "conv2": pg.conv(3, 3, cout, cout, bias=True),
        "bn2": pg.bn(cout),
    }
    if downsample:
        p["ds_conv"] = pg.conv(1, 1, cin, cout, bias=True)
        p["ds_bn"] = pg.bn(cout)
    return p


def make_resnet18_params(pg, in_channels, num_classes):
    params = {
        "conv1": pg.conv(7, 7, in_channels, 64, bias=False),
        "bn1": pg.bn(64),
        "layers": [],
    }
    in_ch = 64
    for out_ch, nblocks, stride in [(64, 2, 1), (128, 2, 2), (256, 2, 2), (512, 2, 2)]:
        blocks = []
        downsample = (stride != 1) or (in_ch != out_ch)
        blocks.append((basic_block_params(pg, in_ch, out_ch, downsample), stride))
        in_ch = out_ch
        for _ in range(1, nblocks):
            blocks.append((basic_block_params(pg, in_ch, out_ch, False), 1))
        params["layers"].append(blocks)
    params["fc"] = pg.linear(512, num_classes)
    return params


# ---------------------------------------------------------------------------
# Forward pass (mirrors ResNet.forward / BasicBlock.forward)
# ---------------------------------------------------------------------------
def basic_block_forward(p, x, stride):
    identity = x
    out = conv_bn(x, *p["conv1"], p["bn1"], stride=stride, pad=1, relu=True)
    if "ds_conv" in p:
        identity = conv_bn(x, *p["ds_conv"], p["ds_bn"], stride=stride, pad=0,
                           relu=False)
    # conv2 -> bn2 -> (+identity) -> relu, all fused in one Pallas kernel.
    out = conv_bn(out, *p["conv2"], p["bn2"], stride=1, pad=1, relu=True,
                  residual=identity)
    return out


def resnet_forward(params, x_nchw):
    x = jnp.transpose(x_nchw, (0, 2, 3, 1)).astype(jnp.bfloat16)  # NCHW -> NHWC
    w, b = params["conv1"]
    x = conv_bn(x, w, b, params["bn1"], stride=2, pad=3, relu=True)
    x = maxpool2d(x, k=3, stride=2, pad=1)
    for blocks in params["layers"]:
        for bp, stride in blocks:
            x = basic_block_forward(bp, x, stride)
    x = global_avgpool(x)                                          # (N, 512) f32
    fw, fb = params["fc"]
    ones = jnp.ones((fb.shape[0],), jnp.float32)
    logits = fused_matmul(x, fw, ones, fb, relu=False,
                          out_dtype=jnp.float32)                   # (N, classes)
    return logits


# ---------------------------------------------------------------------------
if __name__ == "__main__":
    key = jax.random.PRNGKey(0)
    pg = ParamGen(jax.random.fold_in(key, 1))
    params = make_resnet18_params(pg, in_channels=3, num_classes=10)

    x = jax.random.normal(jax.random.fold_in(key, 2), (2, 3, 64, 64), jnp.float32)

    logits = resnet_forward(params, x)
    logits = jax.block_until_ready(logits)
    assert logits.shape == (2, 10), logits.shape
    assert bool(jnp.all(jnp.isfinite(logits)))
    print("KERNEL_OK")
</pallas_src>

<mosaic_0001>
module attributes {stable_mosaic.version = 11 : i64} {
  func.func @_matmul_bn_kernel(%arg0: i32, %arg1: memref<256x256xbf16, #tpu.memory_space<vmem>>, %arg2: memref<256x64xbf16, #tpu.memory_space<vmem>>, %arg3: memref<1x64xf32, #tpu.memory_space<vmem>>, %arg4: memref<1x64xf32, #tpu.memory_space<vmem>>, %arg5: memref<256x64xbf16, #tpu.memory_space<vmem>>) attributes {dimension_semantics = [#tpu.dimension_semantics<parallel>], iteration_bounds = array<i64: 8>, scalar_prefetch = 0 : i64, scratch_operands = 0 : i64, tpu.core_type = #tpu.core_type<tc>, window_params = [{transform_indices = @transform_0, window_bounds = array<i64: 256, 256>}, {pipeline_mode = #tpu.pipeline_mode<synchronous>, transform_indices = @transform_1, window_bounds = array<i64: 256, 64>}, {pipeline_mode = #tpu.pipeline_mode<synchronous>, transform_indices = @transform_2, window_bounds = array<i64: 1, 64>}, {pipeline_mode = #tpu.pipeline_mode<synchronous>, transform_indices = @transform_3, window_bounds = array<i64: 1, 64>}, {transform_indices = @transform_4, window_bounds = array<i64: 256, 64>}]} {
    %c0 = arith.constant 0 : index
    %c0_0 = arith.constant 0 : index
    %0 = vector.load %arg1[%c0, %c0_0] : memref<256x256xbf16, #tpu.memory_space<vmem>>, vector<256x256xbf16>
    %c0_1 = arith.constant 0 : index
    %c0_2 = arith.constant 0 : index
    %1 = vector.load %arg2[%c0_1, %c0_2] : memref<256x64xbf16, #tpu.memory_space<vmem>>, vector<256x64xbf16>
    %cst = arith.constant dense<0.000000e+00> : vector<256x64xf32>
    %2 = tpu.matmul %0, %1, %cst {dimension_numbers = #tpu.dot_dimension_numbers<[1], [0], [0], [1], [0, 0, 1, 1], [], []>} : vector<256x256xbf16>, vector<256x64xbf16>, vector<256x64xf32> -> vector<256x64xf32>
    %c0_3 = arith.constant 0 : index
    %c0_4 = arith.constant 0 : index
    %3 = vector.load %arg3[%c0_3, %c0_4] : memref<1x64xf32, #tpu.memory_space<vmem>>, vector<1x64xf32>
    %4 = vector.broadcast %3 : vector<1x64xf32> to vector<256x64xf32>
    %5 = arith.mulf %2, %4 : vector<256x64xf32>
    %c0_5 = arith.constant 0 : index
    %c0_6 = arith.constant 0 : index
    %6 = vector.load %arg4[%c0_5, %c0_6] : memref<1x64xf32, #tpu.memory_space<vmem>>, vector<1x64xf32>
    %7 = vector.broadcast %6 : vector<1x64xf32> to vector<256x64xf32>
    %8 = arith.addf %5, %7 : vector<256x64xf32>
    %cst_7 = arith.constant 0.000000e+00 : f32
    %9 = vector.broadcast %cst_7 : f32 to vector<256x64xf32>
    %10 = arith.maximumf %8, %9 : vector<256x64xf32>
    %11 = arith.truncf %10 : vector<256x64xf32> to vector<256x64xbf16>
    %c0_8 = arith.constant 0 : index
    %c0_9 = arith.constant 0 : index
    %12 = vector.load %arg5[%c0_8, %c0_9] : memref<256x64xbf16, #tpu.memory_space<vmem>>, vector<256x64xbf16>
    tpu.vector_store %arg5[%c0_8, %c0_9], %11 {strides = array<i32>} : memref<256x64xbf16, #tpu.memory_space<vmem>>, vector<256x64xbf16>,
    return
  }
  func.func @transform_0(%arg0: i32) -> (i32, i32) {
    %c0_i32 = arith.constant 0 : i32
    %c0_i32_0 = arith.constant 0 : i32
    return %arg0, %c0_i32 : i32, i32
  }
  func.func @transform_1(%arg0: i32) -> (i32, i32) {
    %c0_i32 = arith.constant 0 : i32
    %c0_i32_0 = arith.constant 0 : i32
    %c0_i32_1 = arith.constant 0 : i32
    return %c0_i32, %c0_i32_0 : i32, i32
  }
  func.func @transform_2(%arg0: i32) -> (i32, i32) {
    %c0_i32 = arith.constant 0 : i32
    %c0_i32_0 = arith.constant 0 : i32
    %c0_i32_1 = arith.constant 0 : i32
    return %c0_i32, %c0_i32_0 : i32, i32
  }
  func.func @transform_3(%arg0: i32) -> (i32, i32) {
    %c0_i32 = arith.constant 0 : i32
    %c0_i32_0 = arith.constant 0 : i32
    %c0_i32_1 = arith.constant 0 : i32
    return %c0_i32, %c0_i32_0 : i32, i32
  }
  func.func @transform_4(%arg0: i32) -> (i32, i32) {
    %c0_i32 = arith.constant 0 : i32
    %c0_i32_0 = arith.constant 0 : i32
    return %arg0, %c0_i32 : i32, i32
  }
}

</mosaic_0001>

<bundles_post_ra>
// kernel: tpu_custom_call.1
= control target key start
LH: loop header
LB: loop body
LE: loop exit
PB: predicated region body
PF: predicated region fallthrough
CT: control target
= control target key end

     0   :  { %9 = vsyncpa [#allocation3], 0  ;;  %s1827_s0 = inlined_call_operand.hbm [shape: bf16[2048,256], index: 0, kind: input, shape index: {}]   ;;  %s1828_s1 = inlined_call_operand.vmem [shape: bf16[256,64], index: 1, kind: input, shape index: {}]   ;;  %s1829_s2 = inlined_call_operand.vmem [shape: f32[1,64], index: 2, kind: input, shape index: {}]   ;;  %s1830_s3 = inlined_call_operand.vmem [shape: f32[1,64], index: 3, kind: input, shape index: {}]   ;;  %s1831_s4 = inlined_call_operand.vmem [shape: bf16[2048,64], index: 4, kind: output, shape index: {}]  }
   0x1   :  { %11 = vsyncpa [#allocation3 + $0x1], 0  ;;  %s1498_s15 = smov 0   ;;  %s1500_s16 = smov 0  }
   0x2   :  { %s1502_s17 = smov 0   ;;  %s1504_s18 = smov 0  }
   0x3 LB: > { %s1041_s19 = sadd.s32 4294967295, %s1468_s18   ;;  %s1518_s20 = sadd.s32 1, %s1468_s18   ;;  %s1468_s18 = sphi %s1504_s18, %s1838_s18   ;;  %s1464_s17 = sphi %s1502_s17, %s1837_s17   ;;  %s1460_s16 = sphi %s1500_s16, %s1836_s16   ;;  %s1456_s15 = sphi %s1498_s15, %s1835_s15  }
   0x4   : > { %s21_s21 = ssub.s32 %s1468_s18, %s1518_s20  ;;  %s24_s22 = sadd.s32 1, %s1464_s17 }
   0x5   : > { %p22_p0 = scmp.eq.s32.totalorder %s21_s21, 0  ;;  %p31_p1 = scmp.ne.s32.totalorder %s1464_s17, %s1460_s16 }
   0x6   : > { %p32_p2 = scmp.eq.s32.totalorder %s1468_s18, 0  ;;  %p37_p3 = scmp.ne.s32.totalorder %s1460_s16, %s1456_s15 }
   0x7   : > { %s1528_s23 = scalar_select %p22_p0, %s1464_s17, %s24_s22  }
   0x8   : > { %p33_p4 = por %p32_p2, %p31_p1  ;;  %p38_p5 = scmp.eq.s32.totalorder %s1041_s19, 0 }
   0x9   : > { %p1305_p6 = scmp.lt.s32.totalorder %s1468_s18, 8  ;;  %s159_s25 = sand.u32 1, %s1464_s17  }
   0xa   : > { %p1533_p7 = por %p38_p5, %p37_p3  ;;  %s1045_s26 = sshll.u32 %s159_s25, 8 }
   0xb   : > { %s1138_s27 = sshll.u32 %s1468_s18, 12  ;;  %s163_s5 = scalar_lea.vmem [#allocation2], %s1045_s26 }
   0xc   : > { %s1542_s30 = scalar_lea.hbm %s1827_s0, %s1138_s27  ;;  %s171_s6 = sshll.u32 %s163_s5, 4  ;;  %s1544_s6 = int_to_ptr.vmem [resolvable:$true] %s171_s6 }
   0xd   : > { %p1546_p8 = pnand %p1305_p6, %p33_p4  ;;  %s1551_s8 = scalar_lea.sflag [#allocation3], %s159_s25 }
   0xe   : > { %s1404_s9 = scalar_lea.hbm %s1542_s30, 4096  ;;  %s1409_s12 = scalar_lea.hbm %s1827_s0, 32768 }
   0xf   : > { %p1405_p10 = scmp.ne.s32.totalorder %s1542_s30, %s1404_s9  ;;  %p1406_p11 = pneg %p1546_p8 }
  0x10   : > { %p1410_p0 = scmp.lt.u32.totalorder %s1542_s30, %s1827_s0  ;;  %p1411_p1 = scmp.lt.u32.totalorder %s1409_s12, %s1404_s9 }
  0x11   : > { %p1407_p12 = pnand %p1406_p11, %p1405_p10  ;;  %p1413_p3 = scmp.lt.u32.totalorder %s1404_s9, %s1542_s30 }
  0x12   : > { %p1412_p2 = por %p1411_p1, %p1410_p0 }
  0x13   : > { %p1408_p13 = pneg %p1407_p12 }
  0x14   : > { %p1414_p4 = por %p1413_p3, %p1412_p2 }
  0x16   : > { %p1415_p5 = pnand %p1414_p4, %p1408_p13 }
  0x18   : > { %1418 = shalt.err (!%p1415_p5)
}
  0x19   : > { %s1419_s15 = scalar_lea.vmem %s1544_s6, 4096  ;;  %s1470_s21 = smov [#allocation2]  }
  0x1a   : > { %p1420_p6 = scmp.ne.s32.totalorder %s1544_s6, %s1419_s15  ;;  %s1424_s22 = sshll.u32 %s1470_s21, 4  ;;  %s1425_s22 = int_to_ptr.vmem [resolvable:$false] %s1424_s22 }
  0x1b   : > { %s1426_s25 = scalar_lea.vmem %s1425_s22, 8192  ;;  %p1427_p9 = scmp.lt.s32.totalorder %s1544_s6, %s1425_s22 }
  0x1c   : > { %p1422_p10 = pnand %p1420_p6, %p1406_p11  ;;  %p1428_p0 = scmp.lt.s32.totalorder %s1426_s25, %s1419_s15 }
  0x1e   : > { %p1423_p12 = pneg %p1422_p10  ;;  %p1429_p1 = por %p1428_p0, %p1427_p9 }
  0x20   : > { %p1430_p2 = pnand %p1429_p1, %p1423_p12 }
  0x22   : > { %1433 = shalt.err (!%p1430_p2)
}
  0x23   : > { %s1471_s26 = smov 128   ;;  %s1472_s27 = smov 8  }
  0x24   : > { %1304 = dma.hbm_to_vmem [thread:$0]  (!%p1546_p8), %s1542_s30, 4096, %s1544_s6, %s1551_s8, %s1471_s26, %s1471_s26, %s1472_s27  }
  0x25   : > { %p179_p11 = scmp.lt.s32.totalorder %s1468_s18, 9  ;;  %p1834_p13 = scmp.ge.s32.totalorder %s1468_s18, 1 }
  0x27   : > { %p180_p3 = pnand %p1834_p13, %p179_p11 }
  0x28   : > { %s185_s28 = sand.u32 (!%p180_p3), 1, %s1460_s16  }
  0x29   : > { %183 = sbr.rel (%p180_p3) target bundleno = 364 (0x16c), region = 36  ;;  %s1050_s29 = sshll.u32 (!%p180_p3), %s185_s28, 8 }
  0x2a   : > { %s186_s5 = scalar_lea.sflag (!%p180_p3), [#allocation3], %s185_s28  ;;  %s1583_s9 = scalar_lea.vmem (!%p180_p3), [#allocation2], %s1050_s29 }
  0x30   : > { %1451 = dma.done.wait (%p1533_p7), %s186_s5, 4096  }
  0x31   : > { %1453 = vsyncadd (%p1533_p7), %s186_s5, 4294963200  ;;  %v1340_v0 = vld [vmem:[%s1828_s1 + $0x40] sm:$0xff]   ;;  %v1342_v2 = vld [vmem:[%s1828_s1 + $0x48] sm:$0xff]   ;;  %s1051_s25 = sshll.u32 %s1041_s19, 5  ;;  %vm941_vm0 = vcmask 519168  }
  0x32   : > { %v1341_v1 = vld [vmem:[%s1828_s1] sm:$0xff]   ;;  %1171 = vmatprep.subr.bf16.mxu0 %v1340_v0  ;;  %1283 = vmatprep.subr.bf16.mxu1 %v1340_v0  ;;  %v1343_v3 = vld [vmem:[%s1828_s1 + $0x8] sm:$0xff]   ;;  %v1344_v4 = vld [vmem:[%s1828_s1 + $0x50] sm:$0xff]   ;;  %p216_p7 = scmp.lt.s32.totalorder %s1051_s25, 255 }
  0x33   : > { %1172 = vmatpush3.bf16.msra.mxu0 %v1341_v1  ;;  %1291 = vmatpush3.bf16.msra.mxu1 %v1341_v1  ;;  %v1345_v5 = vld [vmem:[%s1828_s1 + $0x10] sm:$0xff]   ;;  %v1346_v6 = vld [vmem:[%s1828_s1 + $0x58] sm:$0xff]   ;;  %v1348_v8 = vld [vmem:[%s1828_s1 + $0x60] sm:$0xff]  }
  0x34   : > { %1173 = vmatprep.subr.bf16.mxu0 %v1342_v2  ;;  %1284 = vmatprep.subr.bf16.mxu1 %v1342_v2  ;;  %v1347_v7 = vld [vmem:[%s1828_s1 + $0x18] sm:$0xff]   ;;  %v1349_v9 = vld [vmem:[%s1828_s1 + $0x20] sm:$0xff]   ;;  %v1350_v10 = vld [vmem:[%s1828_s1 + $0x68] sm:$0xff]   ;;  %s1840_s25 = smov (!%p216_p7, %s1051_s25), 255 }
  0x35   : > { %v1358_v11 = vld [vmem:[%s1583_s9 + $0x4] ss:$8 sps:$4 sm:$0xff]   ;;  %v1352_v14 = vld [vmem:[%s1828_s1 + $0x70] sm:$0xff]   ;;  %v1354_v16 = vld [vmem:[%s1828_s1 + $0x78] sm:$0xff]   ;;  %s1052_s18 = sshll.u32 %s1840_s25, 2 }
  0x36   : > { %v1361_v12 = vld [vmem:[%s1583_s9 + $0x84] ss:$8 sps:$4 sm:$0xff]   ;;  %574 = vmatprep.mubr.bf16.mxu0 %v1358_v11  ;;  %v1353_v15 = vld [vmem:[%s1828_s1 + $0x30] sm:$0xff]   ;;  %v1355_v17 = vld [vmem:[%s1828_s1 + $0x38] sm:$0xff]   ;;  %s1692_s5 = scalar_lea.vmem %s1831_s4, %s1052_s18 }
  0x37   : > { %1174 = vmatpush3.bf16.msra.mxu0 %v1343_v3  ;;  %1292 = vmatpush3.bf16.msra.mxu1 %v1343_v3  ;;  %v1351_v13 = vld [vmem:[%s1828_s1 + $0x28] sm:$0xff]   ;;  %v1362_v20 = vld [vmem:[%s1583_s9 + $0x14] ss:$8 sps:$4 sm:$0xff]   ;;  %v1366_v22 = vld [vmem:[%s1583_s9 + $0x10] ss:$8 sps:$4 sm:$0xff]  }
  0x38   : > { %1175 = vmatprep.subr.bf16.mxu0 %v1344_v4  ;;  %1285 = vmatprep.subr.bf16.mxu1 %v1344_v4  ;;  %v1356_v18 = vld [vmem:[%s1583_s9] ss:$8 sps:$4 sm:$0xff]   ;;  %v1364_v21 = vld [vmem:[%s1583_s9 + $0x94] ss:$8 sps:$4 sm:$0xff]   ;;  %v1367_v23 = vld [vmem:[%s1583_s9 + $0x90] ss:$8 sps:$4 sm:$0xff]  }
  0x39   : > { %638 = vmatprep.mubr.bf16.mxu1 %v1361_v12  ;;  %v1359_v19 = vld [vmem:[%s1583_s9 + $0x80] ss:$8 sps:$4 sm:$0xff]   ;;  %v1368_v24 = vld [vmem:[%s1583_s9 + $0x24] ss:$8 sps:$4 sm:$0xff]   ;;  %v1374_v28 = vld [vmem:[%s1583_s9 + $0x34] ss:$8 sps:$4 sm:$0xff]  }
  0x3a   : > { %v1370_v25 = vld [vmem:[%s1583_s9 + $0xa4] ss:$8 sps:$4 sm:$0xff]   ;;  %v1372_v26 = vld [vmem:[%s1583_s9 + $0x20] ss:$8 sps:$4 sm:$0xff]   ;;  %v1376_v29 = vld [vmem:[%s1583_s9 + $0xb4] ss:$8 sps:$4 sm:$0xff]  }
  0x3b   : > { %1176 = vmatpush3.bf16.msra.mxu0 %v1345_v5  ;;  %1293 = vmatpush3.bf16.msra.mxu1 %v1345_v5  ;;  %v1373_v27 = vld [vmem:[%s1583_s9 + $0xa0] ss:$8 sps:$4 sm:$0xff]   ;;  %v1378_v30 = vld [vmem:[%s1583_s9 + $0x30] ss:$8 sps:$4 sm:$0xff]   ;;  %v1380_v32 = vld [vmem:[%s1583_s9 + $0x44] ss:$8 sps:$4 sm:$0xff]  }
  0x3c   : > { %1177 = vmatprep.subr.bf16.mxu0 %v1346_v6  ;;  %1286 = vmatprep.subr.bf16.mxu1 %v1346_v6  ;;  %v1379_v31 = vld [vmem:[%s1583_s9 + $0xb0] ss:$8 sps:$4 sm:$0xff]   ;;  %v1382_v33 = vld [vmem:[%s1583_s9 + $0xc4] ss:$8 sps:$4 sm:$0xff]   ;;  %v1384_v34 = vld [vmem:[%s1583_s9 + $0x40] ss:$8 sps:$4 sm:$0xff]  }
  0x3d   : > { %v1385_v35 = vld [vmem:[%s1583_s9 + $0xc0] ss:$8 sps:$4 sm:$0xff]   ;;  %v1386_v36 = vld [vmem:[%s1583_s9 + $0x54] ss:$8 sps:$4 sm:$0xff]   ;;  %v1390_v38 = vld [vmem:[%s1583_s9 + $0x50] ss:$8 sps:$4 sm:$0xff]  }
  0x3e   : > { %v1388_v37 = vld [vmem:[%s1583_s9 + $0xd4] ss:$8 sps:$4 sm:$0xff]   ;;  %v1391_v39 = vld [vmem:[%s1583_s9 + $0xd0] ss:$8 sps:$4 sm:$0xff]   ;;  %v1392_v40 = vld [vmem:[%s1583_s9 + $0x64] ss:$8 sps:$4 sm:$0xff]  }
  0x3f   : > { %1178 = vmatpush3.bf16.msra.mxu0 %v1347_v7  ;;  %1294 = vmatpush3.bf16.msra.mxu1 %v1347_v7  ;;  %v1394_v41 = vld [vmem:[%s1583_s9 + $0xe4] ss:$8 sps:$4 sm:$0xff]   ;;  %v1396_v42 = vld [vmem:[%s1583_s9 + $0x60] ss:$8 sps:$4 sm:$0xff]   ;;  %v1398_v44 = vld [vmem:[%s1583_s9 + $0x74] ss:$8 sps:$4 sm:$0xff]  }
  0x40   : > { %1179 = vmatprep.subr.bf16.mxu0 %v1348_v8  ;;  %1287 = vmatprep.subr.bf16.mxu1 %v1348_v8  ;;  %v1397_v43 = vld [vmem:[%s1583_s9 + $0xe0] ss:$8 sps:$4 sm:$0xff]   ;;  %v1400_v45 = vld [vmem:[%s1583_s9 + $0xf4] ss:$8 sps:$4 sm:$0xff]   ;;  %v1402_v46 = vld [vmem:[%s1583_s9 + $0x70] ss:$8 sps:$4 sm:$0xff]  }
  0x41   : > { %v1403_v47 = vld [vmem:[%s1583_s9 + $0xf0] ss:$8 sps:$4 sm:$0xff]   ;;  %v1674_v51 = vld [vmem:[%s1829_s2] ss:$0 sm:$0xff] }
  0x42   : > { %v1679_v57 = vld [vmem:[%s1830_s3] ss:$0 sm:$0xff] }
  0x43   : > { %1180 = vmatpush3.bf16.msra.mxu0 %v1349_v9  ;;  %1295 = vmatpush3.bf16.msra.mxu1 %v1349_v9 }
  0x44   : > { %1181 = vmatprep.subr.bf16.mxu0 %v1350_v10  ;;  %1288 = vmatprep.subr.bf16.mxu1 %v1350_v10 }
  0x47   : > { %1182 = vmatpush3.bf16.msra.mxu0 %v1351_v13  ;;  %1296 = vmatpush3.bf16.msra.mxu1 %v1351_v13 }
  0x48   : > { %1183 = vmatprep.subr.bf16.mxu0 %v1352_v14  ;;  %1289 = vmatprep.subr.bf16.mxu1 %v1352_v14 }
  0x4b   : > { %1184 = vmatpush3.bf16.msra.mxu0 %v1353_v15  ;;  %1297 = vmatpush3.bf16.msra.mxu1 %v1353_v15 }
  0x4c   : > { %1185 = vmatprep.subr.bf16.mxu0 %v1354_v16  ;;  %1290 = vmatprep.subr.bf16.mxu1 %v1354_v16 }
  0x4f   : > { %1186 = vmatpush3.bf16.msra.mxu0 %v1355_v17  ;;  %1298 = vmatpush3.bf16.msra.mxu1 %v1355_v17 }
  0x52   : > { %575 = vmatmul.mubr.bf16.vlgmr.msra.gmra.mrb[0].mxu0 %v1356_v18  ;;  %639 = vmatmul.mubr.bf16.vlgmr.msra.gmra.mrb[0].mxu1 %v1359_v19 }
  0x53   : > { %582 = vmatprep.mubr.bf16.mxu0 %v1362_v20  ;;  %646 = vmatprep.mubr.bf16.mxu1 %v1364_v21 }
  0x5a   : > { %583 = vmatmul.mubr.bf16.gmra.mrb[4].mxu0 %v1366_v22  ;;  %647 = vmatmul.mubr.bf16.gmra.mrb[4].mxu1 %v1367_v23 }
  0x5b   : > { %590 = vmatprep.mubr.bf16.mxu0 %v1368_v24  ;;  %654 = vmatprep.mubr.bf16.mxu1 %v1370_v25 }
  0x62   : > { %591 = vmatmul.mubr.bf16.gmra.mrb[8].mxu0 %v1372_v26  ;;  %655 = vmatmul.mubr.bf16.gmra.mrb[8].mxu1 %v1373_v27 }
  0x63   : > { %598 = vmatprep.mubr.bf16.mxu0 %v1374_v28  ;;  %662 = vmatprep.mubr.bf16.mxu1 %v1376_v29 }
  0x6a   : > { %599 = vmatmul.mubr.bf16.gmra.mrb[12].mxu0 %v1378_v30  ;;  %663 = vmatmul.mubr.bf16.gmra.mrb[12].mxu1 %v1379_v31 }
  0x6b   : > { %606 = vmatprep.mubr.bf16.mxu0 %v1380_v32  ;;  %670 = vmatprep.mubr.bf16.mxu1 %v1382_v33 }
  0x72   : > { %607 = vmatmul.mubr.bf16.gmra.mrb[16].mxu0 %v1384_v34  ;;  %671 = vmatmul.mubr.bf16.gmra.mrb[16].mxu1 %v1385_v35 }
  0x73   : > { %614 = vmatprep.mubr.bf16.mxu0 %v1386_v36  ;;  %678 = vmatprep.mubr.bf16.mxu1 %v1388_v37 }
  0x7a   : > { %615 = vmatmul.mubr.bf16.gmra.mrb[20].mxu0 %v1390_v38  ;;  %679 = vmatmul.mubr.bf16.gmra.mrb[20].mxu1 %v1391_v39 }
  0x7b   : > { %622 = vmatprep.mubr.bf16.mxu0 %v1392_v40  ;;  %686 = vmatprep.mubr.bf16.mxu1 %v1394_v41 }
  0x82   : > { %623 = vmatmul.mubr.bf16.gmra.mrb[24].mxu0 %v1396_v42  ;;  %687 = vmatmul.mubr.bf16.gmra.mrb[24].mxu1 %v1397_v43 }
  0x83   : > { %630 = vmatprep.mubr.bf16.mxu0 %v1398_v44  ;;  %694 = vmatprep.mubr.bf16.mxu1 %v1400_v45 }
  0x8a   : > { %631 = vmatmul.mubr.bf16.gmra.mrb[28].mxu0 %v1402_v46  ;;  %695 = vmatmul.mubr.bf16.gmra.mrb[28].mxu1 %v1403_v47 }
 0x125   : > { %v1187_v48 = vpop.f32.mrb[0].mxu0  ;;  %v1235_v49 = vpop.f32.mrb[0].mxu1 }
 0x126   : > { %v1188_v50 = vpop.f32.mrb[1].mxu0  ;;  %v1236_v52 = vpop.f32.mrb[1].mxu1 }
 0x127   : > { %v1189_v53 = vadd.f32 %v1188_v50, %v1187_v48  ;;  %v1237_v54 = vadd.f32 %v1236_v52, %v1235_v49  ;;  %v1190_v55 = vpop.f32.mrb[2].mxu0  ;;  %v1238_v56 = vpop.f32.mrb[2].mxu1 }
 0x128   : > { %v1191_v58 = vpop.f32.mrb[3].mxu0  ;;  %v1239_v59 = vpop.f32.mrb[3].mxu1 }
 0x129   : > { %v710_v60 = vmul.f32 %v1189_v53, %v1674_v51  ;;  %v726_v61 = vmul.f32 %v1237_v54, %v1674_v51  ;;  %v1192_v62 = vadd.f32 %v1191_v58, %v1190_v55  ;;  %v1240_v63 = vadd.f32 %v1239_v59, %v1238_v56 }
 0x12b   : > { %v749_v0 = vadd.f32 %v1679_v57, %v710_v60  ;;  %v765_v1 = vadd.f32 %v1679_v57, %v726_v61  ;;  %v711_v2 = vmul.f32 %v1192_v62, %v1674_v51  ;;  %v727_v3 = vmul.f32 %v1240_v63, %v1674_v51 }
 0x12d   : > { %v781_v4 = vmax.f32 %v749_v0, 0.0  ;;  %v797_v5 = vmax.f32 %v765_v1, 0.0  ;;  %v750_v6 = vadd.f32 %v1679_v57, %v711_v2  ;;  %v766_v7 = vadd.f32 %v1679_v57, %v727_v3  ;;  %v1193_v8 = vpop.f32.mrb[4].mxu0  ;;  %v1241_v9 = vpop.f32.mrb[4].mxu1 }
 0x12e   : > { %v1194_v10 = vpop.f32.mrb[5].mxu0  ;;  %v1242_v11 = vpop.f32.mrb[5].mxu1 }
 0x12f   : > { %v1139_v12 = vpack.c.bf16 %v781_v4, %v781_v4  ;;  %v1155_v13 = vpack.c.bf16 %v797_v5, %v797_v5  ;;  %v782_v14 = vmax.f32 %v750_v6, 0.0  ;;  %v798_v15 = vmax.f32 %v766_v7, 0.0  ;;  %v1196_v16 = vpop.f32.mrb[6].mxu0  ;;  %v1244_v17 = vpop.f32.mrb[6].mxu1 }
 0x130   : > { %v1195_v18 = vadd.f32 %v1194_v10, %v1193_v8  ;;  %v1243_v19 = vadd.f32 %v1242_v11, %v1241_v9  ;;  %v1197_v20 = vpop.f32.mrb[7].mxu0  ;;  %v1245_v21 = vpop.f32.mrb[7].mxu1 }
 0x131   : > { %942 = vst.msk [vmem:[%s1692_s5] sm:$0xf] %vm941_vm0, %v1139_v12  ;;  %958 = vst.msk [vmem:[%s1692_s5 + $0x40] sm:$0xf] %vm941_vm0, %v1155_v13  ;;  %v1140_v22 = vpack.c.bf16 %v782_v14, %v782_v14  ;;  %v1156_v23 = vpack.c.bf16 %v798_v15, %v798_v15  ;;  %v1198_v24 = vadd.f32 %v1197_v20, %v1196_v16 }
 0x132   : > { %v1246_v25 = vadd.f32 %v1245_v21, %v1244_v17  ;;  %v712_v26 = vmul.f32 %v1195_v18, %v1674_v51  ;;  %v728_v27 = vmul.f32 %v1243_v19, %v1674_v51 }
 0x133   : > { %943 = vst.msk [vmem:[%s1692_s5 + $0x4] sm:$0xf] %vm941_vm0, %v1140_v22  ;;  %959 = vst.msk [vmem:[%s1692_s5 + $0x44] sm:$0xf] %vm941_vm0, %v1156_v23  ;;  %v713_v28 = vmul.f32 %v1198_v24, %v1674_v51 }
 0x134   : > { %v729_v29 = vmul.f32 %v1246_v25, %v1674_v51  ;;  %v751_v30 = vadd.f32 %v1679_v57, %v712_v26  ;;  %v767_v31 = vadd.f32 %v1679_v57, %v728_v27 }
 0x135   : > { %v752_v32 = vadd.f32 %v1679_v57, %v713_v28  ;;  %v1199_v34 = vpop.f32.mrb[8].mxu0  ;;  %v1247_v35 = vpop.f32.mrb[8].mxu1 }
 0x136   : > { %v768_v33 = vadd.f32 %v1679_v57, %v729_v29  ;;  %v783_v36 = vmax.f32 %v751_v30, 0.0  ;;  %v799_v37 = vmax.f32 %v767_v31, 0.0  ;;  %v1200_v38 = vpop.f32.mrb[9].mxu0  ;;  %v1248_v39 = vpop.f32.mrb[9].mxu1 }
 0x137   : > { %v784_v40 = vmax.f32 %v752_v32, 0.0  ;;  %v1201_v42 = vadd.f32 %v1200_v38, %v1199_v34  ;;  %v1249_v43 = vadd.f32 %v1248_v39, %v1247_v35  ;;  %v1202_v44 = vpop.f32.mrb[10].mxu0  ;;  %v1250_v45 = vpop.f32.mrb[10].mxu1 }
 0x138   : > { %v800_v41 = vmax.f32 %v768_v33, 0.0  ;;  %v1141_v46 = vpack.c.bf16 %v783_v36, %v783_v36  ;;  %v1157_v47 = vpack.c.bf16 %v799_v37, %v799_v37  ;;  %v1203_v48 = vpop.f32.mrb[11].mxu0  ;;  %v1251_v49 = vpop.f32.mrb[11].mxu1 }
 0x139   : > { %v1142_v50 = vpack.c.bf16 %v784_v40, %v784_v40  ;;  %v714_v53 = vmul.f32 %v1201_v42, %v1674_v51  ;;  %v730_v54 = vmul.f32 %v1249_v43, %v1674_v51  ;;  %v1204_v55 = vadd.f32 %v1203_v48, %v1202_v44 }
 0x13a   : > { %v1158_v52 = vpack.c.bf16 %v800_v41, %v800_v41  ;;  %944 = vst.msk [vmem:[%s1692_s5 + $0x8] sm:$0xf] %vm941_vm0, %v1141_v46  ;;  %960 = vst.msk [vmem:[%s1692_s5 + $0x48] sm:$0xf] %vm941_vm0, %v1157_v47  ;;  %v1252_v56 = vadd.f32 %v1251_v49, %v1250_v45 }
 0x13b   : > { %945 = vst.msk [vmem:[%s1692_s5 + $0xc] sm:$0xf] %vm941_vm0, %v1142_v50  ;;  %v753_v58 = vadd.f32 %v1679_v57, %v714_v53  ;;  %v769_v59 = vadd.f32 %v1679_v57, %v730_v54  ;;  %v715_v60 = vmul.f32 %v1204_v55, %v1674_v51 }
 0x13c   : > { %961 = vst.msk [vmem:[%s1692_s5 + $0x4c] sm:$0xf] %vm941_vm0, %v1158_v52  ;;  %v731_v61 = vmul.f32 %v1252_v56, %v1674_v51 }
 0x13d   : > { %v785_v62 = vmax.f32 %v753_v58, 0.0  ;;  %v801_v63 = vmax.f32 %v769_v59, 0.0  ;;  %v1205_v0 = vpop.f32.mrb[12].mxu0  ;;  %v1253_v1 = vpop.f32.mrb[12].mxu1  ;;  %v754_v2 = vadd.f32 %v1679_v57, %v715_v60 }
 0x13e   : > { %v770_v3 = vadd.f32 %v1679_v57, %v731_v61  ;;  %v1206_v4 = vpop.f32.mrb[13].mxu0  ;;  %v1254_v5 = vpop.f32.mrb[13].mxu1 }
 0x13f   : > { %v1143_v6 = vpack.c.bf16 %v785_v62, %v785_v62  ;;  %v1159_v7 = vpack.c.bf16 %v801_v63, %v801_v63  ;;  %v1207_v8 = vadd.f32 %v1206_v4, %v1205_v0  ;;  %v1255_v9 = vadd.f32 %v1254_v5, %v1253_v1  ;;  %v1208_v10 = vpop.f32.mrb[14].mxu0  ;;  %v1256_v11 = vpop.f32.mrb[14].mxu1 }
 0x140   : > { %v786_v12 = vmax.f32 %v754_v2, 0.0  ;;  %v802_v13 = vmax.f32 %v770_v3, 0.0  ;;  %v1209_v14 = vpop.f32.mrb[15].mxu0  ;;  %v1257_v15 = vpop.f32.mrb[15].mxu1 }
 0x141   : > { %946 = vst.msk [vmem:[%s1692_s5 + $0x10] sm:$0xf] %vm941_vm0, %v1143_v6  ;;  %962 = vst.msk [vmem:[%s1692_s5 + $0x50] sm:$0xf] %vm941_vm0, %v1159_v7  ;;  %v716_v16 = vmul.f32 %v1207_v8, %v1674_v51  ;;  %v732_v17 = vmul.f32 %v1255_v9, %v1674_v51  ;;  %v1210_v18 = vadd.f32 %v1209_v14, %v1208_v10 }
 0x142   : > { %v1258_v19 = vadd.f32 %v1257_v15, %v1256_v11  ;;  %v1144_v20 = vpack.c.bf16 %v786_v12, %v786_v12  ;;  %v1160_v21 = vpack.c.bf16 %v802_v13, %v802_v13 }
 0x143   : > { %v755_v22 = vadd.f32 %v1679_v57, %v716_v16  ;;  %v771_v23 = vadd.f32 %v1679_v57, %v732_v17  ;;  %v717_v24 = vmul.f32 %v1210_v18, %v1674_v51 }
 0x144   : > { %v733_v25 = vmul.f32 %v1258_v19, %v1674_v51  ;;  %947 = vst.msk [vmem:[%s1692_s5 + $0x14] sm:$0xf] %vm941_vm0, %v1144_v20  ;;  %963 = vst.msk [vmem:[%s1692_s5 + $0x54] sm:$0xf] %vm941_vm0, %v1160_v21 }
 0x145   : > { %v787_v26 = vmax.f32 %v755_v22, 0.0  ;;  %v803_v27 = vmax.f32 %v771_v23, 0.0  ;;  %v756_v28 = vadd.f32 %v1679_v57, %v717_v24  ;;  %v1211_v30 = vpop.f32.mrb[16].mxu0  ;;  %v1259_v31 = vpop.f32.mrb[16].mxu1 }
 0x146   : > { %v772_v29 = vadd.f32 %v1679_v57, %v733_v25  ;;  %v1212_v32 = vpop.f32.mrb[17].mxu0  ;;  %v1260_v33 = vpop.f32.mrb[17].mxu1 }
 0x147   : > { %v1145_v34 = vpack.c.bf16 %v787_v26, %v787_v26  ;;  %v1161_v35 = vpack.c.bf16 %v803_v27, %v803_v27  ;;  %v788_v36 = vmax.f32 %v756_v28, 0.0  ;;  %v1214_v38 = vpop.f32.mrb[18].mxu0  ;;  %v1262_v39 = vpop.f32.mrb[18].mxu1  ;;  %v1213_v40 = vadd.f32 %v1212_v32, %v1211_v30 }
 0x148   : > { %v804_v37 = vmax.f32 %v772_v29, 0.0  ;;  %v1261_v41 = vadd.f32 %v1260_v33, %v1259_v31  ;;  %v1215_v42 = vpop.f32.mrb[19].mxu0  ;;  %v1263_v43 = vpop.f32.mrb[19].mxu1 }
 0x149   : > { %948 = vst.msk [vmem:[%s1692_s5 + $0x18] sm:$0xf] %vm941_vm0, %v1145_v34  ;;  %964 = vst.msk [vmem:[%s1692_s5 + $0x58] sm:$0xf] %vm941_vm0, %v1161_v35  ;;  %v1146_v44 = vpack.c.bf16 %v788_v36, %v788_v36  ;;  %v1216_v46 = vadd.f32 %v1215_v42, %v1214_v38  ;;  %v1264_v47 = vadd.f32 %v1263_v43, %v1262_v39 }
 0x14a   : > { %v1162_v45 = vpack.c.bf16 %v804_v37, %v804_v37  ;;  %v718_v48 = vmul.f32 %v1213_v40, %v1674_v51  ;;  %v734_v49 = vmul.f32 %v1261_v41, %v1674_v51 }
 0x14b   : > { %949 = vst.msk [vmem:[%s1692_s5 + $0x1c] sm:$0xf] %vm941_vm0, %v1146_v44  ;;  %v719_v50 = vmul.f32 %v1216_v46, %v1674_v51  ;;  %v735_v52 = vmul.f32 %v1264_v47, %v1674_v51 }
 0x14c   : > { %965 = vst.msk [vmem:[%s1692_s5 + $0x5c] sm:$0xf] %vm941_vm0, %v1162_v45  ;;  %v757_v53 = vadd.f32 %v1679_v57, %v718_v48  ;;  %v773_v54 = vadd.f32 %v1679_v57, %v734_v49 }
 0x14d   : > { %v758_v55 = vadd.f32 %v1679_v57, %v719_v50  ;;  %v774_v56 = vadd.f32 %v1679_v57, %v735_v52  ;;  %v1217_v58 = vpop.f32.mrb[20].mxu0  ;;  %v1265_v59 = vpop.f32.mrb[20].mxu1 }
 0x14e   : > { %v789_v60 = vmax.f32 %v757_v53, 0.0  ;;  %v805_v61 = vmax.f32 %v773_v54, 0.0  ;;  %v1218_v62 = vpop.f32.mrb[21].mxu0  ;;  %v1266_v63 = vpop.f32.mrb[21].mxu1 }
 0x14f   : > { %v790_v0 = vmax.f32 %v758_v55, 0.0  ;;  %v806_v1 = vmax.f32 %v774_v56, 0.0  ;;  %v1219_v2 = vadd.f32 %v1218_v62, %v1217_v58  ;;  %v1267_v3 = vadd.f32 %v1266_v63, %v1265_v59  ;;  %v1220_v4 = vpop.f32.mrb[22].mxu0  ;;  %v1268_v5 = vpop.f32.mrb[22].mxu1 }
 0x150   : > { %v1147_v6 = vpack.c.bf16 %v789_v60, %v789_v60  ;;  %v1163_v7 = vpack.c.bf16 %v805_v61, %v805_v61  ;;  %v1221_v8 = vpop.f32.mrb[23].mxu0  ;;  %v1269_v9 = vpop.f32.mrb[23].mxu1 }
 0x151   : > { %v1148_v10 = vpack.c.bf16 %v790_v0, %v790_v0  ;;  %v1164_v11 = vpack.c.bf16 %v806_v1, %v806_v1  ;;  %v720_v12 = vmul.f32 %v1219_v2, %v1674_v51  ;;  %v736_v13 = vmul.f32 %v1267_v3, %v1674_v51 }
 0x152   : > { %950 = vst.msk [vmem:[%s1692_s5 + $0x20] sm:$0xf] %vm941_vm0, %v1147_v6  ;;  %966 = vst.msk [vmem:[%s1692_s5 + $0x60] sm:$0xf] %vm941_vm0, %v1163_v7  ;;  %v1222_v14 = vadd.f32 %v1221_v8, %v1220_v4  ;;  %v1270_v15 = vadd.f32 %v1269_v9, %v1268_v5 }
 0x153   : > { %951 = vst.msk [vmem:[%s1692_s5 + $0x24] sm:$0xf] %vm941_vm0, %v1148_v10  ;;  %967 = vst.msk [vmem:[%s1692_s5 + $0x64] sm:$0xf] %vm941_vm0, %v1164_v11  ;;  %v759_v16 = vadd.f32 %v1679_v57, %v720_v12  ;;  %v775_v17 = vadd.f32 %v1679_v57, %v736_v13 }
 0x154   : > { %v721_v18 = vmul.f32 %v1222_v14, %v1674_v51  ;;  %v737_v19 = vmul.f32 %v1270_v15, %v1674_v51 }
 0x155   : > { %v791_v20 = vmax.f32 %v759_v16, 0.0  ;;  %v807_v21 = vmax.f32 %v775_v17, 0.0  ;;  %v1223_v22 = vpop.f32.mrb[24].mxu0  ;;  %v1271_v23 = vpop.f32.mrb[24].mxu1 }
 0x156   : > { %v760_v24 = vadd.f32 %v1679_v57, %v721_v18  ;;  %v776_v25 = vadd.f32 %v1679_v57, %v737_v19  ;;  %v1224_v26 = vpop.f32.mrb[25].mxu0  ;;  %v1272_v27 = vpop.f32.mrb[25].mxu1 }
 0x157   : > { %v1149_v28 = vpack.c.bf16 %v791_v20, %v791_v20  ;;  %v1165_v29 = vpack.c.bf16 %v807_v21, %v807_v21  ;;  %v1225_v30 = vadd.f32 %v1224_v26, %v1223_v22  ;;  %v1273_v31 = vadd.f32 %v1272_v27, %v1271_v23  ;;  %v1226_v32 = vpop.f32.mrb[26].mxu0  ;;  %v1274_v33 = vpop.f32.mrb[26].mxu1 }
 0x158   : > { %v792_v34 = vmax.f32 %v760_v24, 0.0  ;;  %v808_v35 = vmax.f32 %v776_v25, 0.0  ;;  %v1227_v36 = vpop.f32.mrb[27].mxu0  ;;  %v1275_v37 = vpop.f32.mrb[27].mxu1 }
 0x159   : > { %952 = vst.msk [vmem:[%s1692_s5 + $0x28] sm:$0xf] %vm941_vm0, %v1149_v28  ;;  %968 = vst.msk [vmem:[%s1692_s5 + $0x68] sm:$0xf] %vm941_vm0, %v1165_v29  ;;  %v722_v38 = vmul.f32 %v1225_v30, %v1674_v51  ;;  %v738_v39 = vmul.f32 %v1273_v31, %v1674_v51  ;;  %v1228_v40 = vadd.f32 %v1227_v36, %v1226_v32 }
 0x15a   : > { %v1276_v41 = vadd.f32 %v1275_v37, %v1274_v33  ;;  %v1150_v42 = vpack.c.bf16 %v792_v34, %v792_v34  ;;  %v1166_v43 = vpack.c.bf16 %v808_v35, %v808_v35 }
 0x15b   : > { %v761_v44 = vadd.f32 %v1679_v57, %v722_v38  ;;  %v777_v45 = vadd.f32 %v1679_v57, %v738_v39  ;;  %v723_v46 = vmul.f32 %v1228_v40, %v1674_v51 }
 0x15c   : > { %v739_v47 = vmul.f32 %v1276_v41, %v1674_v51  ;;  %953 = vst.msk [vmem:[%s1692_s5 + $0x2c] sm:$0xf] %vm941_vm0, %v1150_v42  ;;  %969 = vst.msk [vmem:[%s1692_s5 + $0x6c] sm:$0xf] %vm941_vm0, %v1166_v43 }
 0x15d   : > { %v793_v48 = vmax.f32 %v761_v44, 0.0  ;;  %v809_v49 = vmax.f32 %v777_v45, 0.0  ;;  %v762_v50 = vadd.f32 %v1679_v57, %v723_v46  ;;  %v1229_v53 = vpop.f32.mrb[28].mxu0  ;;  %v1277_v54 = vpop.f32.mrb[28].mxu1 }
 0x15e   : > { %v778_v52 = vadd.f32 %v1679_v57, %v739_v47  ;;  %v1230_v55 = vpop.f32.mrb[29].mxu0  ;;  %v1278_v56 = vpop.f32.mrb[29].mxu1 }
 0x15f   : > { %v1151_v58 = vpack.c.bf16 %v793_v48, %v793_v48  ;;  %v1167_v59 = vpack.c.bf16 %v809_v49, %v809_v49  ;;  %v794_v60 = vmax.f32 %v762_v50, 0.0  ;;  %v1232_v62 = vpop.f32.mrb[30].mxu0  ;;  %v1280_v63 = vpop.f32.mrb[30].mxu1  ;;  %v1231_v0 = vadd.f32 %v1230_v55, %v1229_v53 }
 0x160   : > { %v810_v61 = vmax.f32 %v778_v52, 0.0  ;;  %v1279_v1 = vadd.f32 %v1278_v56, %v1277_v54  ;;  %v1233_v2 = vpop.f32.mrb[31].mxu0  ;;  %v1281_v3 = vpop.f32.mrb[31].mxu1 }
 0x161   : > { %954 = vst.msk [vmem:[%s1692_s5 + $0x30] sm:$0xf] %vm941_vm0, %v1151_v58  ;;  %970 = vst.msk [vmem:[%s1692_s5 + $0x70] sm:$0xf] %vm941_vm0, %v1167_v59  ;;  %v1152_v4 = vpack.c.bf16 %v794_v60, %v794_v60  ;;  %v1234_v6 = vadd.f32 %v1233_v2, %v1232_v62  ;;  %v1282_v7 = vadd.f32 %v1281_v3, %v1280_v63 }
 0x162   : > { %v1168_v5 = vpack.c.bf16 %v810_v61, %v810_v61  ;;  %v724_v8 = vmul.f32 %v1231_v0, %v1674_v51  ;;  %v740_v9 = vmul.f32 %v1279_v1, %v1674_v51 }
 0x163   : > { %955 = vst.msk [vmem:[%s1692_s5 + $0x34] sm:$0xf] %vm941_vm0, %v1152_v4  ;;  %v725_v10 = vmul.f32 %v1234_v6, %v1674_v51  ;;  %v741_v11 = vmul.f32 %v1282_v7, %v1674_v51 }
 0x164   : > { %971 = vst.msk [vmem:[%s1692_s5 + $0x74] sm:$0xf] %vm941_vm0, %v1168_v5  ;;  %v763_v12 = vadd.f32 %v1679_v57, %v724_v8  ;;  %v779_v13 = vadd.f32 %v1679_v57, %v740_v9 }
 0x165   : > { %v764_v14 = vadd.f32 %v1679_v57, %v725_v10  ;;  %v780_v15 = vadd.f32 %v1679_v57, %v741_v11 }
 0x166   : > { %v795_v16 = vmax.f32 %v763_v12, 0.0  ;;  %v811_v17 = vmax.f32 %v779_v13, 0.0 }
 0x167   : > { %v796_v18 = vmax.f32 %v764_v14, 0.0  ;;  %v812_v19 = vmax.f32 %v780_v15, 0.0 }
 0x168   : > { %v1153_v20 = vpack.c.bf16 %v795_v16, %v795_v16  ;;  %v1169_v21 = vpack.c.bf16 %v811_v17, %v811_v17 }
 0x169   : > { %v1154_v22 = vpack.c.bf16 %v796_v18, %v796_v18  ;;  %v1170_v23 = vpack.c.bf16 %v812_v19, %v812_v19 }
 0x16a   : > { %956 = vst.msk [vmem:[%s1692_s5 + $0x38] sm:$0xf] %vm941_vm0, %v1153_v20  ;;  %972 = vst.msk [vmem:[%s1692_s5 + $0x78] sm:$0xf] %vm941_vm0, %v1169_v21 }
 0x16b   : > { %957 = vst.msk [vmem:[%s1692_s5 + $0x3c] sm:$0xf] %vm941_vm0, %v1154_v22  ;;  %973 = vst.msk [vmem:[%s1692_s5 + $0x7c] sm:$0xf] %vm941_vm0, %v1170_v23 }
 0x16c PF: > { %p14_p8 = scmp.ge.s32.totalorder %s1518_s20, 10   ;;  %s1835_s15 = smov %s1460_s16 }
 0x16d   : > { %s1836_s16 = smov %s1464_s17  ;;  %s1837_s17 = smov %s1528_s23 }
 0x16e   : > { %s1838_s18 = smov %s1518_s20  ;;  %16 = sbr.rel (!%p14_p8) target bundleno = 3 (0x3), region = 76 }
 0x175   :  { %996 = vsyncpa [#allocation3], 1 }
 0x176   :  { %998 = vsyncpa [#allocation3 + $0x1], 1 }

</bundles_post_ra>
